<compile_context>
chip_gen: v7x
topology: tpu7x:2x2x1
jax: 0.10.0
libtpu: 0.0.40
codegen_flags: <defaults>
</compile_context>

<pallas_src>
import jax
import jax.numpy as jnp
from jax.experimental import pallas as pl
from jax.experimental.pallas import tpu as pltpu

EPS = 1e-5
NEG_SLOPE = 0.01


def _inc_down_kernel(x_ref, w_ref, rsel_ref, csel_ref, gamma_ref, beta_ref, o_ref):
    # x_ref:     (NB, Cin, Hk, Wk)   original (or pre-subsampled) spatial block
    # w_ref:     (Cin, Cout, 1, 1)   conv weight, pre-transposed for broadcast, f32
    # rsel_ref:  (Ho, Hk)            0/1 row-selection  (picks rows 0,2,4,...)
    # csel_ref:  (Wk, Wo)            0/1 col-selection  (picks cols 0,2,4,...)
    # gamma_ref: (Cout, 1, 1)        InstanceNorm gamma, f32
    # beta_ref:  (Cout, 1, 1)        InstanceNorm beta, f32
    # o_ref:     (NB, Cout, Ho, Wo)
    nb, cin, _, _ = x_ref.shape
    _, cout, ho, wo = o_ref.shape

    rsel = rsel_ref[...]
    csel = csel_ref[...]
    gamma = gamma_ref[...]
    beta = beta_ref[...]
    inv_p = 1.0 / float(ho * wo)

    for b in range(nb):            # static unroll: NB is small by construction
        # 1x1 stride-2 conv = (stride-2 spatial selection) + (Cin contraction).
        acc = jnp.zeros((cout, ho, wo), dtype=jnp.float32)
        for ci in range(cin):      # static unroll over input channels
            xc = x_ref[b, ci]                                    # (Hk, Wk)
            # Exact 0/1 selection matmuls on the (idle) MXU:
            xr = jnp.dot(rsel, xc)                               # (Ho, Wk)  == xc[::2, :]
            xs = jnp.dot(xr, csel,
                         preferred_element_type=jnp.float32)     # (Ho, Wo)  == xc[::2, ::2]
            # Channel contraction as broadcast-FMA (minimal FLOPs, f32 accum).
            acc = acc + w_ref[ci] * xs[None, :, :]               # (Cout, Ho, Wo)

        # Instance norm: per-output-channel spatial stats (biased var, eps=1e-5).
        mean = jnp.sum(jnp.sum(acc, axis=2, keepdims=True),
                       axis=1, keepdims=True) * inv_p            # (Cout, 1, 1)
        d = acc - mean
        var = jnp.sum(jnp.sum(d * d, axis=2, keepdims=True),
                      axis=1, keepdims=True) * inv_p             # (Cout, 1, 1)
        scale = jax.lax.rsqrt(var + EPS) * gamma
        z = d * scale + beta
        # LeakyReLU(z) == max(z, slope*z) for 0 < slope < 1.
        o_ref[b] = jnp.maximum(z, NEG_SLOPE * z).astype(o_ref.dtype)


def _rup(v, m):
    return ((v + m - 1) // m) * m


def _choose_batch_block(n, per_sample_bytes, target_bytes=1 << 20):
    """Largest divisor NB of n with <= ~1 MiB per-step blocks, keeping the grid
    at >= 2 steps when n allows (v7x megacore sharding + DMA/compute overlap)."""
    best = 1
    for nb in range(1, n + 1):
        if n % nb:
            continue
        if nb > 1 and nb * per_sample_bytes > target_bytes:
            break
        if n >= 2 and (n // nb) < 2:
            continue
        best = nb
    return best


def inc_downsampling_forward(x_nchw, conv_w, conv_b, gamma, beta):
    """x_nchw: (N, Cin, H, W); conv_w: (Cout, Cin, 1, 1); conv_b/gamma/beta: (Cout,)."""
    del conv_b  # cancels exactly through the InstanceNorm mean subtraction
    N, Cin, H, W = x_nchw.shape
    Cout = conv_w.shape[0]
    Ho = (H + 1) // 2
    Wo = (W + 1) // 2

    if (H % 2) or (W % 2):
        # TODO(synk): odd spatial dims fall back to an XLA pre-subsample (one
        # extra HBM pass); fold per-dim strides into the kernel if this matters.
        x_k = x_nchw[:, :, ::2, ::2]
        Hk, Wk = Ho, Wo
    else:
        x_k = x_nchw            # fused path: kernel reads the original tensor
        Hk, Wk = H, W

    cdtype = x_k.dtype
    row_step = Hk // Ho          # 2 on the fused path, 1 on the fallback path
    col_step = Wk // Wo
    rsel = (jnp.arange(Hk)[None, :]
            == (row_step * jnp.arange(Ho))[:, None]).astype(cdtype)   # (Ho, Hk)
    csel = (jnp.arange(Wk)[:, None]
            == (col_step * jnp.arange(Wo))[None, :]).astype(cdtype)   # (Wk, Wo)

    # Weight arranged so w_ref[ci] is directly broadcastable against (Ho, Wo).
    w2 = conv_w.reshape(Cout, Cin)
    w_bcast = jnp.transpose(w2).reshape(Cin, Cout, 1, 1).astype(jnp.float32)
    gamma3 = gamma.reshape(Cout, 1, 1).astype(jnp.float32)
    beta3 = beta.reshape(Cout, 1, 1).astype(jnp.float32)

    esz = x_k.dtype.itemsize
    in_blk_1 = Cin * _rup(Hk, 8) * _rup(Wk, 128) * esz
    out_blk_1 = Cout * _rup(Ho, 8) * _rup(Wo, 128) * esz
    NB = _choose_batch_block(N, in_blk_1 + out_blk_1)

    # VMEM budget: double-buffered (8,128)-padded in/out blocks, resident small
    # operands, and per-sample fp32 intermediates.  Capped at 40 MiB for v7x.
    in_blk = NB * in_blk_1
    out_blk = NB * out_blk_1
    small = (Cin * Cout + 2 * Cout) * 8 * 128 * 4 \
        + (_rup(Ho, 8) * _rup(Hk, 128) + _rup(Wk, 8) * _rup(Wo, 128)) * esz
    interm = 4 * Cout * _rup(Ho, 8) * _rup(Wo, 128) * 4
    need = 2 * (in_blk + out_blk) + small + interm
    vmem_limit = int(min(max(2 * need + (4 << 20), 16 << 20), 40 << 20))

    out = pl.pallas_call(
        _inc_down_kernel,
        out_shape=jax.ShapeDtypeStruct((N, Cout, Ho, Wo), x_nchw.dtype),
        grid=(N // NB,),
        in_specs=[
            pl.BlockSpec((NB, Cin, Hk, Wk), lambda i: (i, 0, 0, 0)),
            pl.BlockSpec((Cin, Cout, 1, 1), lambda i: (0, 0, 0, 0)),
            pl.BlockSpec((Ho, Hk), lambda i: (0, 0)),
            pl.BlockSpec((Wk, Wo), lambda i: (0, 0)),
            pl.BlockSpec((Cout, 1, 1), lambda i: (0, 0, 0)),
            pl.BlockSpec((Cout, 1, 1), lambda i: (0, 0, 0)),
        ],
        out_specs=pl.BlockSpec((NB, Cout, Ho, Wo), lambda i: (i, 0, 0, 0)),
        compiler_params=pltpu.CompilerParams(
            dimension_semantics=("parallel",),
            vmem_limit_bytes=vmem_limit,
        ),
    )(x_k, w_bcast, rsel, csel, gamma3, beta3)
    return out


def _reference(x_nchw, conv_w, conv_b, gamma, beta):
    # Pure-JAX reference of the same forward (train-mode InstanceNorm).
    x_sub = x_nchw[:, :, ::2, ::2]
    w2 = conv_w.reshape(conv_w.shape[0], -1)
    y = jnp.einsum("nchw,oc->nohw", x_sub, w2,
                   precision=jax.lax.Precision.HIGHEST)
    y = y + conv_b[None, :, None, None]
    mean = jnp.mean(y, axis=(2, 3), keepdims=True)
    var = jnp.mean((y - mean) ** 2, axis=(2, 3), keepdims=True)
    y = (y - mean) / jnp.sqrt(var + EPS)
    y = y * gamma[None, :, None, None] + beta[None, :, None, None]
    return jnp.where(y >= 0, y, NEG_SLOPE * y)


if __name__ == "__main__":
    key = jax.random.PRNGKey(0)
    k_x, k_w, k_b, k_g, k_be = jax.random.split(key, 5)

    N, Cin, H, W = 2, 4, 16, 16
    Cout = 8

    x = jax.random.normal(k_x, (N, Cin, H, W), dtype=jnp.float32)
    conv_w = jax.random.normal(k_w, (Cout, Cin, 1, 1), dtype=jnp.float32) * 0.1
    conv_b = jax.random.normal(k_b, (Cout,), dtype=jnp.float32) * 0.1
    gamma = 1.0 + 0.1 * jax.random.normal(k_g, (Cout,), dtype=jnp.float32)
    beta = 0.1 * jax.random.normal(k_be, (Cout,), dtype=jnp.float32)

    out = inc_downsampling_forward(x, conv_w, conv_b, gamma, beta)
    out = jax.block_until_ready(out)

    ref = _reference(x, conv_w, conv_b, gamma, beta)
    assert out.shape == (N, Cout, H // 2, W // 2)
    # Tolerance leaves headroom for MXU f32 matmul precision differences while
    # still catching any real formula/indexing bug (those are O(0.1-1)).
    assert jnp.allclose(out, ref, atol=1e-3, rtol=1e-3), \
        float(jnp.max(jnp.abs(out - ref)))

    print("KERNEL_OK")
</pallas_src>

<mosaic_0001>
module attributes {stable_mosaic.version = 11 : i64} {
  func.func @_inc_down_kernel(%arg0: i32, %arg1: memref<1x4x16x16xf32, #tpu.memory_space<vmem>>, %arg2: memref<4x8x1x1xf32, #tpu.memory_space<vmem>>, %arg3: memref<8x16xf32, #tpu.memory_space<vmem>>, %arg4: memref<16x8xf32, #tpu.memory_space<vmem>>, %arg5: memref<8x1x1xf32, #tpu.memory_space<vmem>>, %arg6: memref<8x1x1xf32, #tpu.memory_space<vmem>>, %arg7: memref<1x8x8x8xf32, #tpu.memory_space<vmem>>) attributes {dimension_semantics = [#tpu.dimension_semantics<parallel>], iteration_bounds = array<i64: 2>, scalar_prefetch = 0 : i64, scratch_operands = 0 : i64, tpu.core_type = #tpu.core_type<tc>, window_params = [{transform_indices = @transform_0, window_bounds = array<i64: 1, 4, 16, 16>}, {pipeline_mode = #tpu.pipeline_mode<synchronous>, transform_indices = @transform_1, window_bounds = array<i64: 4, 8, 1, 1>}, {pipeline_mode = #tpu.pipeline_mode<synchronous>, transform_indices = @transform_2, window_bounds = array<i64: 8, 16>}, {pipeline_mode = #tpu.pipeline_mode<synchronous>, transform_indices = @transform_3, window_bounds = array<i64: 16, 8>}, {pipeline_mode = #tpu.pipeline_mode<synchronous>, transform_indices = @transform_4, window_bounds = array<i64: 8, 1, 1>}, {pipeline_mode = #tpu.pipeline_mode<synchronous>, transform_indices = @transform_5, window_bounds = array<i64: 8, 1, 1>}, {transform_indices = @transform_6, window_bounds = array<i64: 1, 8, 8, 8>}]} {
    %c0 = arith.constant 0 : index
    %c0_0 = arith.constant 0 : index
    %0 = vector.load %arg3[%c0, %c0_0] : memref<8x16xf32, #tpu.memory_space<vmem>>, vector<8x16xf32>
    %c0_1 = arith.constant 0 : index
    %c0_2 = arith.constant 0 : index
    %1 = vector.load %arg4[%c0_1, %c0_2] : memref<16x8xf32, #tpu.memory_space<vmem>>, vector<16x8xf32>
    %c0_3 = arith.constant 0 : index
    %c0_4 = arith.constant 0 : index
    %c0_5 = arith.constant 0 : index
    %2 = vector.load %arg5[%c0_3, %c0_4, %c0_5] : memref<8x1x1xf32, #tpu.memory_space<vmem>>, vector<8x1x1xf32>
    %c0_6 = arith.constant 0 : index
    %c0_7 = arith.constant 0 : index
    %c0_8 = arith.constant 0 : index
    %3 = vector.load %arg6[%c0_6, %c0_7, %c0_8] : memref<8x1x1xf32, #tpu.memory_space<vmem>>, vector<8x1x1xf32>
    %cst = arith.constant 0.000000e+00 : f32
    %4 = vector.broadcast %cst : f32 to vector<8x8x8xf32>
    %c0_9 = arith.constant 0 : index
    %c0_10 = arith.constant 0 : index
    %c0_11 = arith.constant 0 : index
    %c0_12 = arith.constant 0 : index
    %5 = vector.load %arg1[%c0_9, %c0_10, %c0_11, %c0_12] : memref<1x4x16x16xf32, #tpu.memory_space<vmem>>, vector<1x1x16x16xf32>
    %6 = vector.shape_cast %5 : vector<1x1x16x16xf32> to vector<16x16xf32>
    %cst_13 = arith.constant dense<0.000000e+00> : vector<8x16xf32>
    %7 = tpu.matmul %0, %6, %cst_13 {dimension_numbers = #tpu.dot_dimension_numbers<[1], [0], [0], [1], [0, 0, 1, 1], [], []>} : vector<8x16xf32>, vector<16x16xf32>, vector<8x16xf32> -> vector<8x16xf32>
    %cst_14 = arith.constant dense<0.000000e+00> : vector<8x8xf32>
    %8 = tpu.matmul %7, %1, %cst_14 {dimension_numbers = #tpu.dot_dimension_numbers<[1], [0], [0], [1], [0, 0, 1, 1], [], []>} : vector<8x16xf32>, vector<16x8xf32>, vector<8x8xf32> -> vector<8x8xf32>
    %c0_15 = arith.constant 0 : index
    %c0_16 = arith.constant 0 : index
    %c0_17 = arith.constant 0 : index
    %c0_18 = arith.constant 0 : index
    %9 = vector.load %arg2[%c0_15, %c0_16, %c0_17, %c0_18] : memref<4x8x1x1xf32, #tpu.memory_space<vmem>>, vector<1x8x1x1xf32>
    %10 = vector.shape_cast %9 : vector<1x8x1x1xf32> to vector<8x1x1xf32>
    %11 = vector.shape_cast %8 : vector<8x8xf32> to vector<1x8x8xf32>
    %12 = vector.broadcast %10 : vector<8x1x1xf32> to vector<8x8x8xf32>
    %13 = vector.broadcast %11 : vector<1x8x8xf32> to vector<8x8x8xf32>
    %14 = arith.mulf %12, %13 : vector<8x8x8xf32>
    %15 = arith.addf %4, %14 : vector<8x8x8xf32>
    %c0_19 = arith.constant 0 : index
    %c1 = arith.constant 1 : index
    %c0_20 = arith.constant 0 : index
    %c0_21 = arith.constant 0 : index
    %16 = vector.load %arg1[%c0_19, %c1, %c0_20, %c0_21] : memref<1x4x16x16xf32, #tpu.memory_space<vmem>>, vector<1x1x16x16xf32>
    %17 = vector.shape_cast %16 : vector<1x1x16x16xf32> to vector<16x16xf32>
    %cst_22 = arith.constant dense<0.000000e+00> : vector<8x16xf32>
    %18 = tpu.matmul %0, %17, %cst_22 {dimension_numbers = #tpu.dot_dimension_numbers<[1], [0], [0], [1], [0, 0, 1, 1], [], []>} : vector<8x16xf32>, vector<16x16xf32>, vector<8x16xf32> -> vector<8x16xf32>
    %cst_23 = arith.constant dense<0.000000e+00> : vector<8x8xf32>
    %19 = tpu.matmul %18, %1, %cst_23 {dimension_numbers = #tpu.dot_dimension_numbers<[1], [0], [0], [1], [0, 0, 1, 1], [], []>} : vector<8x16xf32>, vector<16x8xf32>, vector<8x8xf32> -> vector<8x8xf32>
    %c1_24 = arith.constant 1 : index
    %c0_25 = arith.constant 0 : index
    %c0_26 = arith.constant 0 : index
    %c0_27 = arith.constant 0 : index
    %20 = vector.load %arg2[%c1_24, %c0_25, %c0_26, %c0_27] : memref<4x8x1x1xf32, #tpu.memory_space<vmem>>, vector<1x8x1x1xf32>
    %21 = vector.shape_cast %20 : vector<1x8x1x1xf32> to vector<8x1x1xf32>
    %22 = vector.shape_cast %19 : vector<8x8xf32> to vector<1x8x8xf32>
    %23 = vector.broadcast %21 : vector<8x1x1xf32> to vector<8x8x8xf32>
    %24 = vector.broadcast %22 : vector<1x8x8xf32> to vector<8x8x8xf32>
    %25 = arith.mulf %23, %24 : vector<8x8x8xf32>
    %26 = arith.addf %15, %25 : vector<8x8x8xf32>
    %c0_28 = arith.constant 0 : index
    %c2 = arith.constant 2 : index
    %c0_29 = arith.constant 0 : index
    %c0_30 = arith.constant 0 : index
    %27 = vector.load %arg1[%c0_28, %c2, %c0_29, %c0_30] : memref<1x4x16x16xf32, #tpu.memory_space<vmem>>, vector<1x1x16x16xf32>
    %28 = vector.shape_cast %27 : vector<1x1x16x16xf32> to vector<16x16xf32>
    %cst_31 = arith.constant dense<0.000000e+00> : vector<8x16xf32>
    %29 = tpu.matmul %0, %28, %cst_31 {dimension_numbers = #tpu.dot_dimension_numbers<[1], [0], [0], [1], [0, 0, 1, 1], [], []>} : vector<8x16xf32>, vector<16x16xf32>, vector<8x16xf32> -> vector<8x16xf32>
    %cst_32 = arith.constant dense<0.000000e+00> : vector<8x8xf32>
    %30 = tpu.matmul %29, %1, %cst_32 {dimension_numbers = #tpu.dot_dimension_numbers<[1], [0], [0], [1], [0, 0, 1, 1], [], []>} : vector<8x16xf32>, vector<16x8xf32>, vector<8x8xf32> -> vector<8x8xf32>
    %c2_33 = arith.constant 2 : index
    %c0_34 = arith.constant 0 : index
    %c0_35 = arith.constant 0 : index
    %c0_36 = arith.constant 0 : index
    %31 = vector.load %arg2[%c2_33, %c0_34, %c0_35, %c0_36] : memref<4x8x1x1xf32, #tpu.memory_space<vmem>>, vector<1x8x1x1xf32>
    %32 = vector.shape_cast %31 : vector<1x8x1x1xf32> to vector<8x1x1xf32>
    %33 = vector.shape_cast %30 : vector<8x8xf32> to vector<1x8x8xf32>
    %34 = vector.broadcast %32 : vector<8x1x1xf32> to vector<8x8x8xf32>
    %35 = vector.broadcast %33 : vector<1x8x8xf32> to vector<8x8x8xf32>
    %36 = arith.mulf %34, %35 : vector<8x8x8xf32>
    %37 = arith.addf %26, %36 : vector<8x8x8xf32>
    %c0_37 = arith.constant 0 : index
    %c3 = arith.constant 3 : index
    %c0_38 = arith.constant 0 : index
    %c0_39 = arith.constant 0 : index
    %38 = vector.load %arg1[%c0_37, %c3, %c0_38, %c0_39] : memref<1x4x16x16xf32, #tpu.memory_space<vmem>>, vector<1x1x16x16xf32>
    %39 = vector.shape_cast %38 : vector<1x1x16x16xf32> to vector<16x16xf32>
    %cst_40 = arith.constant dense<0.000000e+00> : vector<8x16xf32>
    %40 = tpu.matmul %0, %39, %cst_40 {dimension_numbers = #tpu.dot_dimension_numbers<[1], [0], [0], [1], [0, 0, 1, 1], [], []>} : vector<8x16xf32>, vector<16x16xf32>, vector<8x16xf32> -> vector<8x16xf32>
    %cst_41 = arith.constant dense<0.000000e+00> : vector<8x8xf32>
    %41 = tpu.matmul %40, %1, %cst_41 {dimension_numbers = #tpu.dot_dimension_numbers<[1], [0], [0], [1], [0, 0, 1, 1], [], []>} : vector<8x16xf32>, vector<16x8xf32>, vector<8x8xf32> -> vector<8x8xf32>
    %c3_42 = arith.constant 3 : index
    %c0_43 = arith.constant 0 : index
    %c0_44 = arith.constant 0 : index
    %c0_45 = arith.constant 0 : index
    %42 = vector.load %arg2[%c3_42, %c0_43, %c0_44, %c0_45] : memref<4x8x1x1xf32, #tpu.memory_space<vmem>>, vector<1x8x1x1xf32>
    %43 = vector.shape_cast %42 : vector<1x8x1x1xf32> to vector<8x1x1xf32>
    %44 = vector.shape_cast %41 : vector<8x8xf32> to vector<1x8x8xf32>
    %45 = vector.broadcast %43 : vector<8x1x1xf32> to vector<8x8x8xf32>
    %46 = vector.broadcast %44 : vector<1x8x8xf32> to vector<8x8x8xf32>
    %47 = arith.mulf %45, %46 : vector<8x8x8xf32>
    %48 = arith.addf %37, %47 : vector<8x8x8xf32>
    %cst_46 = arith.constant dense<0.000000e+00> : vector<8x8xf32>
    %49 = vector.multi_reduction <add>, %48, %cst_46 [2] : vector<8x8x8xf32> to vector<8x8xf32>
    %50 = vector.shape_cast %49 : vector<8x8xf32> to vector<8x8x1xf32>
    %cst_47 = arith.constant dense<0.000000e+00> : vector<8x1xf32>
    %51 = vector.multi_reduction <add>, %50, %cst_47 [1] : vector<8x8x1xf32> to vector<8x1xf32>
    %52 = vector.shape_cast %51 : vector<8x1xf32> to vector<8x1x1xf32>
    %cst_48 = arith.constant 1.562500e-02 : f32
    %53 = vector.broadcast %cst_48 : f32 to vector<8x1x1xf32>
    %54 = arith.mulf %52, %53 : vector<8x1x1xf32>
    %55 = vector.broadcast %54 : vector<8x1x1xf32> to vector<8x8x8xf32>
    %56 = arith.subf %48, %55 : vector<8x8x8xf32>
    %57 = arith.mulf %56, %56 : vector<8x8x8xf32>
    %cst_49 = arith.constant dense<0.000000e+00> : vector<8x8xf32>
    %58 = vector.multi_reduction <add>, %57, %cst_49 [2] : vector<8x8x8xf32> to vector<8x8xf32>
    %59 = vector.shape_cast %58 : vector<8x8xf32> to vector<8x8x1xf32>
    %cst_50 = arith.constant dense<0.000000e+00> : vector<8x1xf32>
    %60 = vector.multi_reduction <add>, %59, %cst_50 [1] : vector<8x8x1xf32> to vector<8x1xf32>
    %61 = vector.shape_cast %60 : vector<8x1xf32> to vector<8x1x1xf32>
    %cst_51 = arith.constant 1.562500e-02 : f32
    %62 = vector.broadcast %cst_51 : f32 to vector<8x1x1xf32>
    %63 = arith.mulf %61, %62 : vector<8x1x1xf32>
    %cst_52 = arith.constant 9.99999974E-6 : f32
    %64 = vector.broadcast %cst_52 : f32 to vector<8x1x1xf32>
    %65 = arith.addf %63, %64 : vector<8x1x1xf32>
    %66 = math.rsqrt %65 : vector<8x1x1xf32>
    %67 = arith.mulf %66, %2 : vector<8x1x1xf32>
    %68 = vector.broadcast %67 : vector<8x1x1xf32> to vector<8x8x8xf32>
    %69 = arith.mulf %56, %68 : vector<8x8x8xf32>
    %70 = vector.broadcast %3 : vector<8x1x1xf32> to vector<8x8x8xf32>
    %71 = arith.addf %69, %70 : vector<8x8x8xf32>
    %cst_53 = arith.constant 0.00999999977 : f32
    %72 = vector.broadcast %cst_53 : f32 to vector<8x8x8xf32>
    %73 = arith.mulf %72, %71 : vector<8x8x8xf32>
    %74 = arith.maximumf %71, %73 : vector<8x8x8xf32>
    %c0_54 = arith.constant 0 : index
    %c0_55 = arith.constant 0 : index
    %c0_56 = arith.constant 0 : index
    %c0_57 = arith.constant 0 : index
    %75 = vector.load %arg7[%c0_54, %c0_55, %c0_56, %c0_57] : memref<1x8x8x8xf32, #tpu.memory_space<vmem>>, vector<1x8x8x8xf32>
    %76 = vector.shape_cast %75 : vector<1x8x8x8xf32> to vector<8x8x8xf32>
    %77 = vector.shape_cast %74 : vector<8x8x8xf32> to vector<1x8x8x8xf32>
    tpu.vector_store %arg7[%c0_54, %c0_55, %c0_56, %c0_57], %77 {strides = array<i32>} : memref<1x8x8x8xf32, #tpu.memory_space<vmem>>, vector<1x8x8x8xf32>,
    return
  }
  func.func @transform_0(%arg0: i32) -> (i32, i32, i32, i32) {
    %c0_i32 = arith.constant 0 : i32
    %c0_i32_0 = arith.constant 0 : i32
    %c0_i32_1 = arith.constant 0 : i32
    %c0_i32_2 = arith.constant 0 : i32
    return %arg0, %c0_i32, %c0_i32_0, %c0_i32_1 : i32, i32, i32, i32
  }
  func.func @transform_1(%arg0: i32) -> (i32, i32, i32, i32) {
    %c0_i32 = arith.constant 0 : i32
    %c0_i32_0 = arith.constant 0 : i32
    %c0_i32_1 = arith.constant 0 : i32
    %c0_i32_2 = arith.constant 0 : i32
    %c0_i32_3 = arith.constant 0 : i32
    return %c0_i32, %c0_i32_0, %c0_i32_1, %c0_i32_2 : i32, i32, i32, i32
  }
  func.func @transform_2(%arg0: i32) -> (i32, i32) {
    %c0_i32 = arith.constant 0 : i32
    %c0_i32_0 = arith.constant 0 : i32
    %c0_i32_1 = arith.constant 0 : i32
    return %c0_i32, %c0_i32_0 : i32, i32
  }
  func.func @transform_3(%arg0: i32) -> (i32, i32) {
    %c0_i32 = arith.constant 0 : i32
    %c0_i32_0 = arith.constant 0 : i32
    %c0_i32_1 = arith.constant 0 : i32
    return %c0_i32, %c0_i32_0 : i32, i32
  }
  func.func @transform_4(%arg0: i32) -> (i32, i32, i32) {
    %c0_i32 = arith.constant 0 : i32
    %c0_i32_0 = arith.constant 0 : i32
    %c0_i32_1 = arith.constant 0 : i32
    %c0_i32_2 = arith.constant 0 : i32
    return %c0_i32, %c0_i32_0, %c0_i32_1 : i32, i32, i32
  }
  func.func @transform_5(%arg0: i32) -> (i32, i32, i32) {
    %c0_i32 = arith.constant 0 : i32
    %c0_i32_0 = arith.constant 0 : i32
    %c0_i32_1 = arith.constant 0 : i32
    %c0_i32_2 = arith.constant 0 : i32
    return %c0_i32, %c0_i32_0, %c0_i32_1 : i32, i32, i32
  }
  func.func @transform_6(%arg0: i32) -> (i32, i32, i32, i32) {
    %c0_i32 = arith.constant 0 : i32
    %c0_i32_0 = arith.constant 0 : i32
    %c0_i32_1 = arith.constant 0 : i32
    %c0_i32_2 = arith.constant 0 : i32
    return %arg0, %c0_i32, %c0_i32_0, %c0_i32_1 : i32, i32, i32, i32
  }
}

</mosaic_0001>

<bundles_post_ra>
// kernel: tpu_custom_call.1
= control target key start
LH: loop header
LB: loop body
LE: loop exit
PB: predicated region body
PF: predicated region fallthrough
CT: control target
= control target key end

     0   :  { %11 = vsyncpa [#allocation3], 0  ;;  %s2622_s0 = inlined_call_operand.hbm [shape: f32[2,4,16,16], index: 0, kind: input, shape index: {}]   ;;  %s2623_s1 = inlined_call_operand.vmem [shape: f32[4,8,1,1], index: 1, kind: input, shape index: {}]   ;;  %s2624_s2 = inlined_call_operand.vmem [shape: f32[8,16], index: 2, kind: input, shape index: {}]   ;;  %s2625_s3 = inlined_call_operand.vmem [shape: f32[16,8], index: 3, kind: input, shape index: {}]   ;;  %s2626_s4 = inlined_call_operand.vmem [shape: f32[8,1,1], index: 4, kind: input, shape index: {}]   ;;  %s2627_s5 = inlined_call_operand.vmem [shape: f32[8,1,1], index: 5, kind: input, shape index: {}]   ;;  %s2628_s6 = inlined_call_operand.hbm [shape: f32[2,8,8,8], index: 6, kind: output, shape index: {}]  }
   0x1   :  { %13 = vsyncpa [#allocation3 + $0x1], 0 }
   0x2   :  { %14 = vsyncpa [#allocation4], 0 }
   0x3   :  { %16 = vsyncpa [#allocation4 + $0x1], 0  ;;  %s2148_s21 = smov 0   ;;  %s2150_s22 = smov 0  }
   0x4   :  { %s2152_s23 = smov 0   ;;  %s2154_s24 = smov 0  }
   0x5 LB: > { %s2169_s25 = sadd.s32 4294967295, %s2101_s24   ;;  %s1735_s26 = sadd.s32 4294967294, %s2101_s24   ;;  %s2101_s24 = sphi %s2154_s24, %s2641_s24   ;;  %s2097_s23 = sphi %s2152_s23, %s2640_s23   ;;  %s2093_s22 = sphi %s2150_s22, %s2639_s22   ;;  %s2089_s21 = sphi %s2148_s21, %s2638_s21  }
   0x6   : > { %s2173_s27 = sadd.s32 1, %s2101_s24   ;;  %s29_s28 = sadd.s32 1, %s2097_s23 }
   0x7   : > { %s26_s29 = ssub.s32 %s2101_s24, %s2173_s27  ;;  %p36_p0 = scmp.ne.s32.totalorder %s2097_s23, %s2093_s22 }
   0x8   : > { %p27_p1 = scmp.eq.s32.totalorder %s26_s29, 0  ;;  %p37_p2 = scmp.eq.s32.totalorder %s2101_s24, 0 }
   0x9   : > { %p42_p3 = scmp.ne.s32.totalorder %s2093_s22, %s2089_s21  ;;  %p43_p4 = scmp.eq.s32.totalorder %s2169_s25, 0 }
   0xa   : > { %s2185_s30 = scalar_select %p27_p1, %s2097_s23, %s29_s28  }
   0xb   : > { %p2187_p5 = por %p37_p2, %p36_p0  ;;  %p2191_p6 = por %p43_p4, %p42_p3 }
   0xc   : > { %p171_p7 = scmp.eq.s32.totalorder %s2169_s25, 1  ;;  %p177_p8 = scmp.eq.s32.totalorder %s1735_s26, 1 }
   0xd   : > { %p1945_p10 = scmp.lt.s32.totalorder %s2101_s24, 2  ;;  %s212_s11 = sand.u32 1, %s2097_s23  }
   0xe   : > { %p2198_p11 = por %p171_p7, %p36_p0  ;;  %p2202_p12 = por %p177_p8, %p42_p3 }
   0xf   : > { %s1827_s12 = sshll.u32 %s2101_s24, 10  ;;  %s1738_s13 = sshll.u32 %s212_s11, 6 }
  0x10   : > { %s2632_s9 = scalar_select %p2198_p11, 1, 0 }
  0x11   : > { %s2633_s10 = scalar_select %p2202_p12, 1, 0 }
  0x12   : > { %s2211_s16 = scalar_lea.hbm %s2622_s0, %s1827_s12  ;;  %s216_s17 = scalar_lea.vmem [#allocation2], %s1738_s13 }
  0x13   : > { %s223_s18 = sshll.u32 %s216_s17, 4  ;;  %p2215_p13 = pnand %p1945_p10, %p2187_p5  ;;  %s2219_s18 = int_to_ptr.vmem [resolvable:$true] %s223_s18 }
  0x14   : > { %s2221_s20 = scalar_lea.sflag [#allocation3], %s212_s11  ;;  %s2005_s26 = scalar_lea.hbm %s2211_s16, 1024 }
  0x15   : > { %p2006_p0 = scmp.ne.s32.totalorder %s2211_s16, %s2005_s26  ;;  %p2007_p1 = pneg %p2215_p13 }
  0x16   : > { %s2010_s7 = scalar_lea.hbm %s2622_s0, 2048  ;;  %p2011_p4 = scmp.lt.u32.totalorder %s2211_s16, %s2622_s0 }
  0x17   : > { %p2008_p2 = pnand %p2007_p1, %p2006_p0  ;;  %p2012_p5 = scmp.lt.u32.totalorder %s2010_s7, %s2005_s26 }
  0x18   : > { %p2014_p8 = scmp.lt.u32.totalorder %s2005_s26, %s2211_s16 }
  0x19   : > { %p2009_p3 = pneg %p2008_p2  ;;  %p2013_p7 = por %p2012_p5, %p2011_p4 }
  0x1b   : > { %p2015_p10 = por %p2014_p8, %p2013_p7 }
  0x1d   : > { %p2016_p9 = pnand %p2015_p10, %p2009_p3 }
  0x1f   : > { %2019 = shalt.err (!%p2016_p9)
}
  0x20   : > { %s2020_s11 = scalar_lea.vmem %s2219_s18, 1024  ;;  %s2103_s14 = smov [#allocation2]  }
  0x21   : > { %p2021_p0 = scmp.ne.s32.totalorder %s2219_s18, %s2020_s11  ;;  %s2025_s15 = sshll.u32 %s2103_s14, 4  ;;  %s2026_s15 = int_to_ptr.vmem [resolvable:$false] %s2025_s15 }
  0x22   : > { %s2027_s17 = scalar_lea.vmem %s2026_s15, 2048  ;;  %p2028_p11 = scmp.lt.s32.totalorder %s2219_s18, %s2026_s15 }
  0x23   : > { %p2023_p2 = pnand %p2021_p0, %p2007_p1  ;;  %p2029_p4 = scmp.lt.s32.totalorder %s2027_s17, %s2020_s11 }
  0x25   : > { %p2024_p12 = pneg %p2023_p2  ;;  %p2030_p5 = por %p2029_p4, %p2028_p11 }
  0x27   : > { %p2031_p7 = pnand %p2030_p5, %p2024_p12 }
  0x29   : > { %2034 = shalt.err (!%p2031_p7)
}
  0x2a   : > { %s2104_s26 = smov 128   ;;  %s2105_s28 = smov 8  }
  0x2b   : > { %1940 = dma.hbm_to_vmem [thread:$0]  (!%p2215_p13), %s2211_s16, 1024, %s2219_s18, %s2221_s20, %s2104_s26, %s2104_s26, %s2105_s28  }
  0x2c   : > { %p1741_p9 = scmp.ge.s32.totalorder %s2101_s24, 1  ;;  %p231_p1 = scmp.lt.s32.totalorder %s2101_s24, 3 }
  0x2e   : > { %p232_p3 = pnand %p1741_p9, %p231_p1 }
  0x2f   : > { %s2252_s29 = sand.u32 (!%p232_p3), 1, %s2093_s22  }
  0x30   : > { %235 = sbr.rel (%p232_p3) target bundleno = 1010 (0x3f2), region = 44  ;;  %s1742_s7 = sshll.u32 (!%p232_p3), %s2252_s29, 6 }
  0x31   : > { %s238_s12 = scalar_lea.sflag (!%p232_p3), [#allocation3], %s2252_s29  ;;  %s2258_s13 = scalar_lea.vmem (!%p232_p3), [#allocation2], %s1742_s7 }
  0x37   : > { %2080 = dma.done.wait (%p2191_p6), %s238_s12, 1024  }
  0x38   : > { %2082 = vsyncadd (%p2191_p6), %s238_s12, 4294966272  ;;  %v2106_v0 = vmov 0.0|0.0   ;;  %vm2107_vm0 = vmmov 0   ;;  %v2108_v1 = vmov 0.0   ;;  %v2109_v2 = vmov 0   ;;  %v289_v3 = vld [vmem:[%s2258_s13] sm:$0xff] }
  0x39   : > { %1909 = vmatprep.subr.bf16.mxu0 %v2106_v0  ;;  %1857 = vmatprep.mubr.msk.f32.mxu0 %vm2107_vm0, %v2108_v1  ;;  %v290_v4 = vld [vmem:[%s2258_s13 + $0x8] sm:$0xff]  ;;  %v1754_v6 = vld [vmem:[%s2258_s13 + $0x10] sm:$0xff]  ;;  %v1755_v7 = vld [vmem:[%s2258_s13 + $0x18] sm:$0xff]  ;;  %vm291_vm1 = vcmask 130048   ;;  %vm1263_vm2 = vcmask 64512   ;;  %s2548_s12 = scalar_lea.vmem [#allocation5], %s1742_s7 }
  0x3a   : > { %1987 = vset.pattern.permute.xlu0 %v2109_v2  ;;  %1988 = vset.pattern.permute.xlu1 %v2109_v2  ;;  %v1910_v5 = vpack.c.bf16 %v290_v4, %v289_v3  ;;  %v270_v8 = vld [vmem:[%s2624_s2] sm:$0xff]  ;;  %v1916_v9 = vpack.c.bf16 %v1755_v7, %v1754_v6  ;;  %v1775_v13 = vld [vmem:[%s2258_s13 + $0x28] sm:$0xff]  ;;  %v1794_v20 = vld [vmem:[%s2258_s13 + $0x30] sm:$0xff]  ;;  %s1828_s7 = sshll.u32 %s2169_s25, 10  ;;  %s1662_s8 = sshll.u32 %s2548_s12, 4  ;;  %s2576_s8 = int_to_ptr.vmem [resolvable:$true] %s1662_s8 }
  0x3b   : > { %1912 = vmatprep.subr.bf16.mxu1 %v2106_v0  ;;  %1864 = vmatprep.mubr.msk.f32.mxu1 %vm2107_vm0, %v2108_v1  ;;  %v1746_v10 = vld [vmem:[%s2623_s1] ss:$0 sm:$0xff]  ;;  %v1748_v11 = vld [vmem:[%s2623_s1 + $0x2] ss:$0 sm:$0xff]  ;;  %v1747_v15 = vld [vmem:[%s2623_s1 + $0x1] ss:$0 sm:$0xff]  ;;  %s2574_s19 = scalar_lea.hbm %s2628_s6, %s1828_s7 }
  0x3c   : > { %1911 = vmatpush3.bf16.msra.mxu0 %v1910_v5  ;;  %v1774_v12 = vld [vmem:[%s2258_s13 + $0x20] sm:$0xff]  ;;  %487 = vperm.xlu0 %1987, %v1746_v10   ;;  %v272_v16 = vld [vmem:[%s2625_s3 + $0x8] sm:$0xff]  ;;  %v1795_v21 = vld [vmem:[%s2258_s13 + $0x38] sm:$0xff]  ;;  %s1649_s13 = scalar_lea.sflag [#allocation4], %s2252_s29  ;;  %s2035_s20 = scalar_lea.vmem %s2576_s8, 1024 }
  0x3d   : > { %1915 = vmatprep.subr.bf16.mxu0 %v2106_v0  ;;  %v271_v14 = vld [vmem:[%s2625_s3] sm:$0xff]  ;;  %495 = vperm.xlu1 %1988, %v1748_v11   ;;  %v1922_v19 = vpack.c.bf16 %v1775_v13, %v1774_v12  ;;  %v1928_v23 = vpack.c.bf16 %v1795_v21, %v1794_v20  ;;  %v1766_v27 = vld [vmem:[%s2623_s1 + $0x8] ss:$0 sm:$0xff]  ;;  %v1767_v28 = vld [vmem:[%s2623_s1 + $0x9] ss:$0 sm:$0xff]  ;;  %p2036_p6 = scmp.ne.s32.totalorder %s2576_s8, %s2035_s20  ;;  %p2635_p11 = scmp.ne.s32.totalorder %s2632_s9, 0 }
  0x3e   : > { %v1749_v17 = vld [vmem:[%s2623_s1 + $0x3] ss:$0 sm:$0xff]  ;;  %v2299_v18 = vpack.c.bf16 %v272_v16, %v271_v14  ;;  %v1750_v22 = vld [vmem:[%s2623_s1 + $0x4] ss:$0 sm:$0xff]  ;;  %v1751_v24 = vld [vmem:[%s2623_s1 + $0x5] ss:$0 sm:$0xff] }
  0x3f   : > { %1858 = vmatmul.mubr.msk.f32.vlgmr.msra.gmra.mrb[0].mxu0 %vm291_vm1, %v270_v8  ;;  %v1752_v25 = vld [vmem:[%s2623_s1 + $0x6] ss:$0 sm:$0xff]  ;;  %v1753_v26 = vld [vmem:[%s2623_s1 + $0x7] ss:$0 sm:$0xff]  ;;  %v1768_v29 = vld [vmem:[%s2623_s1 + $0xa] ss:$0 sm:$0xff]  ;;  %p2037_p12 = pnand %p2036_p6, %p2635_p11 }
  0x40   : > { %1917 = vmatpush3.bf16.msra.mxu0 %v1916_v9  ;;  %1871 = vmatprep.mubr.msk.f32.mxu0 %vm2107_vm0, %v2108_v1  ;;  %v1769_v30 = vld [vmem:[%s2623_s1 + $0xb] ss:$0 sm:$0xff]  ;;  %v1770_v31 = vld [vmem:[%s2623_s1 + $0xc] ss:$0 sm:$0xff]  ;;  %v1771_v32 = vld [vmem:[%s2623_s1 + $0xd] ss:$0 sm:$0xff] }
  0x41   : > { %1921 = vmatprep.subr.bf16.mxu0 %v2106_v0  ;;  %491 = vperm.xlu0 %1987, %v1747_v15   ;;  %v1772_v33 = vld [vmem:[%s2623_s1 + $0xe] ss:$0 sm:$0xff]  ;;  %v1773_v34 = vld [vmem:[%s2623_s1 + $0xf] ss:$0 sm:$0xff]  ;;  %v1786_v35 = vld [vmem:[%s2623_s1 + $0x10] ss:$0 sm:$0xff]  ;;  %p2038_p13 = pneg %p2037_p12 }
  0x42   : > { %499 = vperm.xlu1 %1988, %v1749_v17   ;;  %1914 = vmatpush3.bf16.msra.mxu1 %v2299_v18  ;;  %v1787_v36 = vld [vmem:[%s2623_s1 + $0x11] ss:$0 sm:$0xff]  ;;  %v1788_v37 = vld [vmem:[%s2623_s1 + $0x12] ss:$0 sm:$0xff]  ;;  %v1789_v38 = vld [vmem:[%s2623_s1 + $0x13] ss:$0 sm:$0xff] }
  0x43   : > { %1872 = vmatmul.mubr.msk.f32.vlgmr.msra.gmra.mrb[2].mxu0 %vm291_vm1, %v270_v8  ;;  %1918 = vmatprep.subr.bf16.mxu1 %v2106_v0  ;;  %v1790_v39 = vld [vmem:[%s2623_s1 + $0x14] ss:$0 sm:$0xff]  ;;  %v1791_v40 = vld [vmem:[%s2623_s1 + $0x15] ss:$0 sm:$0xff]  ;;  %v1792_v41 = vld [vmem:[%s2623_s1 + $0x16] ss:$0 sm:$0xff] }
  0x44   : > { %1923 = vmatpush3.bf16.msra.mxu0 %v1922_v19  ;;  %1885 = vmatprep.mubr.msk.f32.mxu0 %vm2107_vm0, %v2108_v1  ;;  %v1793_v42 = vld [vmem:[%s2623_s1 + $0x17] ss:$0 sm:$0xff]  ;;  %v1806_v43 = vld [vmem:[%s2623_s1 + $0x18] ss:$0 sm:$0xff]  ;;  %v1807_v44 = vld [vmem:[%s2623_s1 + $0x19] ss:$0 sm:$0xff] }
  0x45   : > { %1927 = vmatprep.subr.bf16.mxu0 %v2106_v0  ;;  %503 = vperm.xlu0 %1987, %v1750_v22   ;;  %v1808_v45 = vld [vmem:[%s2623_s1 + $0x1a] ss:$0 sm:$0xff]  ;;  %v1809_v46 = vld [vmem:[%s2623_s1 + $0x1b] ss:$0 sm:$0xff]  ;;  %v1810_v47 = vld [vmem:[%s2623_s1 + $0x1c] ss:$0 sm:$0xff] }
  0x46   : > { %507 = vperm.xlu1 %1988, %v1751_v24   ;;  %v1811_v48 = vld [vmem:[%s2623_s1 + $0x1d] ss:$0 sm:$0xff]  ;;  %v1812_v49 = vld [vmem:[%s2623_s1 + $0x1e] ss:$0 sm:$0xff]  ;;  %v1813_v50 = vld [vmem:[%s2623_s1 + $0x1f] ss:$0 sm:$0xff] }
  0x47   : > { %1886 = vmatmul.mubr.msk.f32.vlgmr.msra.gmra.mrb[4].mxu0 %vm291_vm1, %v270_v8  ;;  %s2110_s25 = smov [#allocation5]  }
  0x48   : > { %1929 = vmatpush3.bf16.msra.mxu0 %v1928_v23  ;;  %1899 = vmatprep.mubr.msk.f32.mxu0 %vm2107_vm0, %v2108_v1  ;;  %s2039_s11 = sshll.u32 %s2110_s25, 4  ;;  %s2040_s11 = int_to_ptr.vmem [resolvable:$false] %s2039_s11 }
  0x49   : > { %511 = vperm.xlu0 %1987, %v1752_v25   ;;  %s2041_s14 = scalar_lea.vmem %s2040_s11, 2048  ;;  %p2042_p8 = scmp.lt.s32.totalorder %s2576_s8, %s2040_s11 }
  0x4a   : > { %515 = vperm.xlu1 %1988, %v1753_v26   ;;  %p2043_p10 = scmp.lt.s32.totalorder %s2041_s14, %s2035_s20 }
  0x4b   : > { %1900 = vmatmul.mubr.msk.f32.vlgmr.msra.gmra.mrb[6].mxu0 %vm291_vm1, %v270_v8 }
  0x4c   : > { %p2044_p0 = por %p2043_p10, %p2042_p8 }
  0x4d   : > { %730 = vperm.xlu0 %1987, %v1766_v27  }
  0x4e   : > { %734 = vperm.xlu1 %1988, %v1767_v28   ;;  %p2045_p2 = pnand %p2044_p0, %p2038_p13 }
  0x51   : > { %738 = vperm.xlu0 %1987, %v1768_v29  }
  0x52   : > { %742 = vperm.xlu1 %1988, %v1769_v30  }
  0x55   : > { %746 = vperm.xlu0 %1987, %v1770_v31  }
  0x56   : > { %750 = vperm.xlu1 %1988, %v1771_v32  }
  0x59   : > { %754 = vperm.xlu0 %1987, %v1772_v33  }
  0x5a   : > { %758 = vperm.xlu1 %1988, %v1773_v34  }
  0x5d   : > { %973 = vperm.xlu0 %1987, %v1786_v35  }
  0x5e   : > { %977 = vperm.xlu1 %1988, %v1787_v36  }
  0x61   : > { %981 = vperm.xlu0 %1987, %v1788_v37  }
  0x62   : > { %985 = vperm.xlu1 %1988, %v1789_v38  }
  0x65   : > { %989 = vperm.xlu0 %1987, %v1790_v39  }
  0x66   : > { %993 = vperm.xlu1 %1988, %v1791_v40  }
  0x69   : > { %997 = vperm.xlu0 %1987, %v1792_v41  }
  0x6a   : > { %1001 = vperm.xlu1 %1988, %v1793_v42  }
  0x6d   : > { %1216 = vperm.xlu0 %1987, %v1806_v43  }
  0x6e   : > { %1220 = vperm.xlu1 %1988, %v1807_v44  }
  0x71   : > { %1224 = vperm.xlu0 %1987, %v1808_v45  }
  0x72   : > { %1228 = vperm.xlu1 %1988, %v1809_v46  }
  0x75   : > { %1232 = vperm.xlu0 %1987, %v1810_v47  }
  0x76   : > { %1236 = vperm.xlu1 %1988, %v1811_v48  }
  0x79   : > { %1240 = vperm.xlu0 %1987, %v1812_v49  }
  0x7a   : > { %1244 = vperm.xlu1 %1988, %v1813_v50  }
  0xbb   : > { %v488_v59 = vpop.permute.xlu0 %487 }
  0xbc   : > { %v496_v60 = vpop.permute.xlu1 %495 }
  0xc0   : > { %v492_v61 = vpop.permute.xlu0 %491 }
  0xc1   : > { %v500_v62 = vpop.permute.xlu1 %499 }
  0xc4   : > { %v504_v63 = vpop.permute.xlu0 %503 }
  0xc5   : > { %v508_v2 = vpop.permute.xlu1 %507 }
  0xc9   : > { %v516_v3 = vpop.permute.xlu1 %515 }
  0xcd   : > { %v735_v5 = vpop.permute.xlu1 %734 }
  0xd1   : > { %v743_v7 = vpop.permute.xlu1 %742 }
  0xd5   : > { %v751_v9 = vpop.permute.xlu1 %750 }
 0x112   : > { %v361_v51 = vpop.f32.mrb[0].mxu0 }
 0x113   : > { %v1859_v52 = vpop.f32.mrb[1].mxu0  ;;  %1865 = vmatmul.mubr.msk.f32.vlgmr.msra.gmra.mrb[0].mxu1 %vm291_vm1, %v361_v51 }
 0x114   : > { %1920 = vmatpush3.bf16.msra.mxu1 %v2299_v18  ;;  %1878 = vmatprep.mubr.msk.f32.mxu1 %vm2107_vm0, %v2108_v1 }
 0x115   : > { %1924 = vmatprep.subr.bf16.mxu1 %v2106_v0 }
 0x116   : > { %v603_v53 = vpop.f32.mrb[2].mxu0 }
 0x117   : > { %v1873_v54 = vpop.f32.mrb[3].mxu0  ;;  %1879 = vmatmul.mubr.msk.f32.vlgmr.msra.gmra.mrb[2].mxu1 %vm291_vm1, %v603_v53 }
 0x118   : > { %1926 = vmatpush3.bf16.msra.mxu1 %v2299_v18  ;;  %1892 = vmatprep.mubr.msk.f32.mxu1 %vm2107_vm0, %v2108_v1 }
 0x119   : > { %1930 = vmatprep.subr.bf16.mxu1 %v2106_v0  ;;  %v512_v0 = vpop.permute.xlu0 %511 }
 0x11a   : > { %v846_v55 = vpop.f32.mrb[4].mxu0 }
 0x11b   : > { %v1887_v56 = vpop.f32.mrb[5].mxu0  ;;  %1893 = vmatmul.mubr.msk.f32.vlgmr.msra.gmra.mrb[4].mxu1 %vm291_vm1, %v846_v55 }
 0x11c   : > { %1932 = vmatpush3.bf16.msra.mxu1 %v2299_v18  ;;  %1906 = vmatprep.mubr.msk.f32.mxu1 %vm2107_vm0, %v2108_v1  ;;  %v759_v1 = vpop.permute.xlu1 %758 }
 0x11d   : > { %v731_v4 = vpop.permute.xlu0 %730 }
 0x11e   : > { %v1089_v57 = vpop.f32.mrb[6].mxu0 }
 0x11f   : > { %v1901_v58 = vpop.f32.mrb[7].mxu0  ;;  %1907 = vmatmul.mubr.msk.f32.vlgmr.msra.gmra.mrb[6].mxu1 %vm291_vm1, %v1089_v57 }
 0x120   : > { %v978_v12 = vpop.permute.xlu1 %977 }
 0x121   : > { %v739_v6 = vpop.permute.xlu0 %738 }
 0x124   : > { %v986_v14 = vpop.permute.xlu1 %985 }
 0x125   : > { %v747_v8 = vpop.permute.xlu0 %746 }
 0x128   : > { %v994_v16 = vpop.permute.xlu1 %993 }
 0x129   : > { %v755_v10 = vpop.permute.xlu0 %754 }
 0x12c   : > { %v1002_v18 = vpop.permute.xlu1 %1001 }
 0x12d   : > { %v974_v11 = vpop.permute.xlu0 %973 }
 0x130   : > { %v1221_v20 = vpop.permute.xlu1 %1220 }
 0x131   : > { %v982_v13 = vpop.permute.xlu0 %981 }
 0x134   : > { %v1229_v23 = vpop.permute.xlu1 %1228 }
 0x135   : > { %v990_v15 = vpop.permute.xlu0 %989 }
 0x138   : > { %v1237_v44 = vpop.permute.xlu1 %1236 }
 0x139   : > { %v998_v17 = vpop.permute.xlu0 %997 }
 0x13d   : > { %v1217_v19 = vpop.permute.xlu0 %1216 }
 0x141   : > { %v1225_v21 = vpop.permute.xlu0 %1224 }
 0x145   : > { %v1233_v39 = vpop.permute.xlu0 %1232 }
 0x1e6   : > { %v434_v22 = vpop.f32.mrb[0].mxu1 }
 0x1e7   : > { %v1866_v24 = vpop.f32.mrb[1].mxu1  ;;  %v519_v25 = vmul.f32 %v492_v61, %v434_v22  ;;  %v518_v26 = vmul.f32 %v488_v59, %v434_v22  ;;  %v522_v27 = vmul.f32 %v504_v63, %v434_v22  ;;  %v520_v28 = vmul.f32 %v496_v60, %v434_v22 }
 0x1e8   : > { %v524_v30 = vmul.f32 %v512_v0, %v434_v22  ;;  %v521_v31 = vmul.f32 %v500_v62, %v434_v22  ;;  %v523_v32 = vmul.f32 %v508_v2, %v434_v22  ;;  %v525_v33 = vmul.f32 %v516_v3, %v434_v22 }
 0x1ea   : > { %v676_v29 = vpop.f32.mrb[2].mxu1 }
 0x1eb   : > { %v1880_v34 = vpop.f32.mrb[3].mxu1  ;;  %v762_v35 = vmul.f32 %v735_v5, %v676_v29  ;;  %v761_v36 = vmul.f32 %v731_v4, %v676_v29  ;;  %v765_v37 = vmul.f32 %v747_v8, %v676_v29  ;;  %v763_v38 = vmul.f32 %v739_v6, %v676_v29  ;;  %v1241_v4 = vpop.permute.xlu0 %1240 }
 0x1ec   : > { %v767_v40 = vmul.f32 %v755_v10, %v676_v29  ;;  %v764_v41 = vmul.f32 %v743_v7, %v676_v29  ;;  %v766_v42 = vmul.f32 %v751_v9, %v676_v29  ;;  %v768_v43 = vmul.f32 %v759_v1, %v676_v29  ;;  %v1245_v10 = vpop.permute.xlu1 %1244 }
 0x1ed   : > { %v770_v45 = vadd.f32 %v762_v35, %v519_v25  ;;  %v769_v46 = vadd.f32 %v761_v36, %v518_v26  ;;  %v773_v47 = vadd.f32 %v765_v37, %v522_v27  ;;  %v771_v48 = vadd.f32 %v763_v38, %v520_v28 }
 0x1ee   : > { %v919_v49 = vpop.f32.mrb[4].mxu1  ;;  %v775_v50 = vadd.f32 %v767_v40, %v524_v30  ;;  %v772_v51 = vadd.f32 %v764_v41, %v521_v31  ;;  %v774_v52 = vadd.f32 %v766_v42, %v523_v32  ;;  %v776_v53 = vadd.f32 %v768_v43, %v525_v33 }
 0x1ef   : > { %v1894_v54 = vpop.f32.mrb[5].mxu1  ;;  %v1005_v55 = vmul.f32 %v978_v12, %v919_v49  ;;  %v1004_v56 = vmul.f32 %v974_v11, %v919_v49  ;;  %v1008_v57 = vmul.f32 %v990_v15, %v919_v49  ;;  %v1006_v58 = vmul.f32 %v982_v13, %v919_v49 }
 0x1f0   : > { %v1010_v59 = vmul.f32 %v998_v17, %v919_v49  ;;  %v1007_v60 = vmul.f32 %v986_v14, %v919_v49  ;;  %v1009_v61 = vmul.f32 %v994_v16, %v919_v49  ;;  %v1011_v62 = vmul.f32 %v1002_v18, %v919_v49 }
 0x1f1   : > { %v1013_v63 = vadd.f32 %v1005_v55, %v770_v45  ;;  %v1012_v2 = vadd.f32 %v1004_v56, %v769_v46  ;;  %v1016_v0 = vadd.f32 %v1008_v57, %v773_v47  ;;  %v1014_v3 = vadd.f32 %v1006_v58, %v771_v48 }
 0x1f2   : > { %v1162_v5 = vpop.f32.mrb[6].mxu1  ;;  %v1018_v6 = vadd.f32 %v1010_v59, %v775_v50  ;;  %v1015_v7 = vadd.f32 %v1007_v60, %v772_v51  ;;  %v1017_v8 = vadd.f32 %v1009_v61, %v774_v52  ;;  %v1019_v9 = vadd.f32 %v1011_v62, %v776_v53 }
 0x1f3   : > { %v1908_v1 = vpop.f32.mrb[7].mxu1  ;;  %v1248_v12 = vmul.f32 %v1221_v20, %v1162_v5  ;;  %v1247_v11 = vmul.f32 %v1217_v19, %v1162_v5  ;;  %v1251_v15 = vmul.f32 %v1233_v39, %v1162_v5  ;;  %v1249_v13 = vmul.f32 %v1225_v21, %v1162_v5 }
 0x1f4   : > { %v1253_v17 = vmul.f32 %v1241_v4, %v1162_v5  ;;  %v1250_v14 = vmul.f32 %v1229_v23, %v1162_v5  ;;  %v1252_v16 = vmul.f32 %v1237_v44, %v1162_v5  ;;  %v1254_v18 = vmul.f32 %v1245_v10, %v1162_v5 }
 0x1f5   : > { %v2415_v22 = vadd.f32 %v1248_v12, %v1013_v63  ;;  %v2417_v24 = vadd.f32 %v1247_v11, %v1012_v2  ;;  %v2419_v25 = vadd.f32 %v1251_v15, %v1016_v0  ;;  %v2421_v26 = vadd.f32 %v1249_v13, %v1014_v3 }
 0x1f6   : > { %v2423_v27 = vadd.f32 %v1253_v17, %v1018_v6  ;;  %v2425_v28 = vadd.f32 %v1250_v14, %v1015_v7  ;;  %v2427_v20 = vadd.f32 %v1252_v16, %v1017_v8  ;;  %v2429_v19 = vadd.f32 %v1254_v18, %v1019_v9 }
 0x1f7   : > { %v1267_v21 = vsel %vm1263_vm2, %v2415_v22, 0.0  ;;  %v1264_v23 = vsel %vm1263_vm2, %v2417_v24, 0.0  ;;  %v1276_v29 = vsel %vm1263_vm2, %v2419_v25, 0.0  ;;  %v1270_v30 = vsel %vm1263_vm2, %v2421_v26, 0.0 }
 0x1f8   : > { %1268 = vadd.xlane.f32.xlu1 %v1267_v21  ;;  %1265 = vadd.xlane.f32.xlu0 %v1264_v23  ;;  %v1282_v31 = vsel %vm1263_vm2, %v2423_v27, 0.0  ;;  %v1273_v32 = vsel %vm1263_vm2, %v2425_v28, 0.0  ;;  %v1279_v33 = vsel %vm1263_vm2, %v2427_v20, 0.0  ;;  %v1285_v34 = vsel %vm1263_vm2, %v2429_v19, 0.0 }
 0x1fc   : > { %1277 = vadd.xlane.f32.xlu1 %v1276_v29  ;;  %1271 = vadd.xlane.f32.xlu0 %v1270_v30 }
 0x200   : > { %1283 = vadd.xlane.f32.xlu1 %v1282_v31  ;;  %1274 = vadd.xlane.f32.xlu0 %v1273_v32 }
 0x204   : > { %1280 = vadd.xlane.f32.xlu0 %v1279_v33 }
 0x208   : > { %1286 = vadd.xlane.f32.xlu0 %v1285_v34 }
 0x285   : > { %v1269_v35 = vpop.xlane.xlu1 %1268  ;;  %v1266_v36 = vpop.xlane.xlu0 %1265 }
 0x286   : > { %v1294_v37 = vrot.slane %v1269_v35, 4  ;;  %v1288_v38 = vrot.slane %v1266_v36, 4 }
 0x288   : > { %v1295_v39 = vadd.f32 %v1294_v37, %v1269_v35  ;;  %v1289_v40 = vadd.f32 %v1288_v38, %v1266_v36 }
 0x289   : > { %v1278_v41 = vpop.xlane.xlu1 %1277  ;;  %v1272_v42 = vpop.xlane.xlu0 %1271 }
 0x28a   : > { %v1296_v43 = vrot.slane %v1295_v39, 2  ;;  %v1290_v44 = vrot.slane %v1289_v40, 2  ;;  %v1312_v45 = vrot.slane %v1278_v41, 4  ;;  %v1300_v46 = vrot.slane %v1272_v42, 4 }
 0x28c   : > { %v1297_v47 = vadd.f32 %v1296_v43, %v1295_v39  ;;  %v1291_v48 = vadd.f32 %v1290_v44, %v1289_v40  ;;  %v1313_v49 = vadd.f32 %v1312_v45, %v1278_v41  ;;  %v1301_v50 = vadd.f32 %v1300_v46, %v1272_v42 }
 0x28d   : > { %v1284_v51 = vpop.xlane.xlu1 %1283  ;;  %v1275_v52 = vpop.xlane.xlu0 %1274 }
 0x28e   : > { %v1298_v53 = vrot.slane %v1297_v47, 1  ;;  %v1292_v54 = vrot.slane %v1291_v48, 1  ;;  %v1314_v55 = vrot.slane %v1313_v49, 2  ;;  %v1302_v56 = vrot.slane %v1301_v50, 2 }
 0x28f   : > { %v1324_v57 = vrot.slane %v1284_v51, 4  ;;  %v1306_v58 = vrot.slane %v1275_v52, 4 }
 0x290   : > { %v1299_v59 = vadd.f32 %v1298_v53, %v1297_v47  ;;  %v1293_v60 = vadd.f32 %v1292_v54, %v1291_v48  ;;  %v1315_v61 = vadd.f32 %v1314_v55, %v1313_v49  ;;  %v1303_v62 = vadd.f32 %v1302_v56, %v1301_v50 }
 0x291   : > { %v1325_v63 = vadd.f32 %v1324_v57, %v1284_v51  ;;  %v1307_v2 = vadd.f32 %v1306_v58, %v1275_v52  ;;  %v1281_v0 = vpop.xlane.xlu0 %1280 }
 0x292   : > { %v1337_v3 = vmul.f32 0.015625, %v1299_v59  ;;  %v1336_v4 = vmul.f32 0.015625, %v1293_v60  ;;  %v1316_v5 = vrot.slane %v1315_v61, 1  ;;  %v1304_v6 = vrot.slane %v1303_v62, 1  ;;  %v1815_v60 = vld [vmem:[%s2627_s5 + $0x1] ss:$0 sm:$0xff] }
 0x293   : > { %v1326_v7 = vrot.slane %v1325_v63, 2  ;;  %v1308_v8 = vrot.slane %v1307_v2, 2  ;;  %v1318_v9 = vrot.slane %v1281_v0, 4 }
 0x294   : > { %v1317_v10 = vadd.f32 %v1316_v5, %v1315_v61  ;;  %v1305_v1 = vadd.f32 %v1304_v6, %v1303_v62  ;;  %v2448_v12 = vsub.f32 %v2415_v22, %v1337_v3  ;;  %v2451_v11 = vsub.f32 %v2417_v24, %v1336_v4  ;;  %v1819_v61 = vld [vmem:[%s2627_s5 + $0x5] ss:$0 sm:$0xff]  ;;  %v1814_v62 = vld [vmem:[%s2627_s5] ss:$0 sm:$0xff] }
 0x295   : > { %v1327_v15 = vadd.f32 %v1326_v7, %v1325_v63  ;;  %v1309_v13 = vadd.f32 %v1308_v8, %v1307_v2  ;;  %v1319_v17 = vadd.f32 %v1318_v9, %v1281_v0  ;;  %v1287_v14 = vpop.xlane.xlu0 %1286  ;;  %v1816_v63 = vld [vmem:[%s2627_s5 + $0x2] ss:$0 sm:$0xff]  ;;  %v1818_v2 = vld [vmem:[%s2627_s5 + $0x4] ss:$0 sm:$0xff] }
 0x296   : > { %v1340_v16 = vmul.f32 0.015625, %v1317_v10  ;;  %v1338_v18 = vmul.f32 0.015625, %v1305_v1  ;;  %v1330_v21 = vrot.slane %v1287_v14, 4  ;;  %v1353_v23 = vmul.f32 %v2448_v12, %v2448_v12 }
 0x297   : > { %v1328_v29 = vrot.slane %v1327_v15, 1  ;;  %v1310_v30 = vrot.slane %v1309_v13, 1  ;;  %v1320_v31 = vrot.slane %v1319_v17, 2  ;;  %v1352_v22 = vmul.f32 %v2451_v11, %v2451_v11 }
 0x298   : > { %v1331_v32 = vadd.f32 %v1330_v21, %v1287_v14  ;;  %v1363_v24 = vsel %vm1263_vm2, %v1353_v23, 0.0  ;;  %v2459_v33 = vsub.f32 %v2421_v26, %v1338_v18  ;;  %v2462_v34 = vsub.f32 %v2419_v25, %v1340_v16 }
 0x299   : > { %v1329_v35 = vadd.f32 %v1328_v29, %v1327_v15  ;;  %v1311_v36 = vadd.f32 %v1310_v30, %v1309_v13  ;;  %v1321_v37 = vadd.f32 %v1320_v31, %v1319_v17  ;;  %1364 = vadd.xlane.f32.xlu0 %v1363_v24  ;;  %v1360_v38 = vsel %vm1263_vm2, %v1352_v22, 0.0 }
 0x29a   : > { %v1332_v39 = vrot.slane %v1331_v32, 2  ;;  %1361 = vadd.xlane.f32.xlu1 %v1360_v38  ;;  %v1354_v40 = vmul.f32 %v2459_v33, %v2459_v33  ;;  %v1356_v25 = vmul.f32 %v2462_v34, %v2462_v34 }
 0x29b   : > { %v1342_v41 = vmul.f32 0.015625, %v1329_v35  ;;  %v1339_v42 = vmul.f32 0.015625, %v1311_v36  ;;  %v1322_v43 = vrot.slane %v1321_v37, 1 }
 0x29c   : > { %v1333_v44 = vadd.f32 %v1332_v39, %v1331_v32  ;;  %v1366_v26 = vsel %vm1263_vm2, %v1354_v40, 0.0  ;;  %v1372_v52 = vsel %vm1263_vm2, %v1356_v25, 0.0 }
 0x29d   : > { %v1323_v45 = vadd.f32 %v1322_v43, %v1321_v37  ;;  %v2471_v46 = vsub.f32 %v2425_v28, %v1339_v42  ;;  %v2474_v47 = vsub.f32 %v2423_v27, %v1342_v41 }
 0x29e   : > { %v1334_v48 = vrot.slane %v1333_v44, 1  ;;  %1367 = vadd.xlane.f32.xlu1 %v1366_v26 }
 0x29f   : > { %v1341_v49 = vmul.f32 0.015625, %v1323_v45  ;;  %v1355_v50 = vmul.f32 %v2471_v46, %v2471_v46  ;;  %v1358_v54 = vmul.f32 %v2474_v47, %v2474_v47 }
 0x2a0   : > { %v1335_v51 = vadd.f32 %v1334_v48, %v1333_v44 }
 0x2a1   : > { %v1369_v53 = vsel %vm1263_vm2, %v1355_v50, 0.0  ;;  %v2483_v28 = vsub.f32 %v2427_v20, %v1341_v49  ;;  %v1378_v57 = vsel %vm1263_vm2, %v1358_v54, 0.0 }
 0x2a2   : > { %v1343_v55 = vmul.f32 0.015625, %v1335_v51  ;;  %1373 = vadd.xlane.f32.xlu1 %v1372_v52  ;;  %1370 = vadd.xlane.f32.xlu0 %v1369_v53  ;;  %v1472_v53 = vlaneseq }
 0x2a3   : > { %v1357_v27 = vmul.f32 %v2483_v28, %v2483_v28 }
 0x2a4   : > { %v2488_v56 = vsub.f32 %v2429_v19, %v1343_v55  ;;  %v1817_v19 = vld [vmem:[%s2627_s5 + $0x3] ss:$0 sm:$0xff] }
 0x2a5   : > { %v1375_v58 = vsel %vm1263_vm2, %v1357_v27, 0.0 }
 0x2a6   : > { %1379 = vadd.xlane.f32.xlu1 %v1378_v57  ;;  %1376 = vadd.xlane.f32.xlu0 %v1375_v58  ;;  %v1359_v59 = vmul.f32 %v2488_v56, %v2488_v56 }
 0x2a8   : > { %v1381_v20 = vsel %vm1263_vm2, %v1359_v59, 0.0 }
 0x2aa   : > { %1382 = vadd.xlane.f32.xlu0 %v1381_v20 }
 0x2b7   : > { %1589 = vperm.xlu1 %1988, %v1815_v60  }
 0x2bb   : > { %1597 = vperm.xlu1 %1988, %v1817_v19  }
 0x2bf   : > { %1605 = vperm.xlu1 %1988, %v1819_v61  }
 0x2c0   : > { %1585 = vperm.xlu0 %1987, %v1814_v62  }
 0x2c4   : > { %1593 = vperm.xlu0 %1987, %v1816_v63  }
 0x2c8   : > { %1601 = vperm.xlu0 %1987, %v1818_v2  }
 0x326   : > { %v1365_v0 = vpop.xlane.xlu0 %1364 }
 0x327   : > { %v1362_v3 = vpop.xlane.xlu1 %1361  ;;  %v1390_v4 = vrot.slane %v1365_v0, 4 }
 0x328   : > { %v1384_v5 = vrot.slane %v1362_v3, 4 }
 0x329   : > { %v1391_v6 = vadd.f32 %v1390_v4, %v1365_v0 }
 0x32a   : > { %v1385_v7 = vadd.f32 %v1384_v5, %v1362_v3  ;;  %v1473_v3 = vshrl.u32 %v1472_v53, 7 }
 0x32b   : > { %v1392_v8 = vrot.slane %v1391_v6, 2  ;;  %v1368_v9 = vpop.xlane.xlu1 %1367 }
 0x32c   : > { %v1386_v10 = vrot.slane %v1385_v7, 2  ;;  %v1396_v1 = vrot.slane %v1368_v9, 4 }
 0x32d   : > { %v1393_v15 = vadd.f32 %v1392_v8, %v1391_v6 }
 0x32e   : > { %v1387_v13 = vadd.f32 %v1386_v10, %v1385_v7  ;;  %v1397_v17 = vadd.f32 %v1396_v1, %v1368_v9 }
 0x32f   : > { %v1394_v14 = vrot.slane %v1393_v15, 1  ;;  %v1374_v16 = vpop.xlane.xlu1 %1373  ;;  %v1371_v18 = vpop.xlane.xlu0 %1370 }
 0x330   : > { %v1388_v21 = vrot.slane %v1387_v13, 1  ;;  %v1398_v23 = vrot.slane %v1397_v17, 2  ;;  %v1408_v29 = vrot.slane %v1374_v16, 4  ;;  %v1402_v30 = vrot.slane %v1371_v18, 4 }
 0x331   : > { %v1395_v31 = vadd.f32 %v1394_v14, %v1393_v15  ;;  %v274_v15 = vld [vmem:[%s2626_s4 + $0x1] sm:$0x1] }
 0x332   : > { %v1389_v22 = vadd.f32 %v1388_v21, %v1387_v13  ;;  %v1399_v32 = vadd.f32 %v1398_v23, %v1397_v17  ;;  %v1409_v24 = vadd.f32 %v1408_v29, %v1374_v16  ;;  %v1403_v35 = vadd.f32 %v1402_v30, %v1371_v18  ;;  %v273_v13 = vld [vmem:[%s2626_s4] sm:$0x1] }
 0x333   : > { %v1433_v36 = vmul.f32 0.015625, %v1395_v31  ;;  %v1380_v37 = vpop.xlane.xlu1 %1379  ;;  %v1377_v38 = vpop.xlane.xlu0 %1376  ;;  %v1474_v17 = vsub.s32 0, %v1473_v3 }
 0x334   : > { %v1432_v39 = vmul.f32 0.015625, %v1389_v22  ;;  %v1400_v40 = vrot.slane %v1399_v32, 1  ;;  %v1410_v41 = vrot.slane %v1409_v24, 2  ;;  %v1404_v42 = vrot.slane %v1403_v35, 2 }
 0x335   : > { %v1441_v43 = vadd.f32 1e-05, %v1433_v36  ;;  %v1420_v44 = vrot.slane %v1380_v37, 4  ;;  %v1414_v26 = vrot.slane %v1377_v38, 4 }
 0x336   : > { %v1440_v45 = vadd.f32 1e-05, %v1432_v39  ;;  %v1401_v25 = vadd.f32 %v1400_v40, %v1399_v32  ;;  %v1411_v48 = vadd.f32 %v1410_v41, %v1409_v24  ;;  %v1405_v49 = vadd.f32 %v1404_v42, %v1403_v35  ;;  %v275_v35 = vld [vmem:[%s2626_s4 + $0x2] sm:$0x1]  ;;  %v277_v41 = vld [vmem:[%s2626_s4 + $0x4] sm:$0x1] }
 0x337   : > { %1989 = vrsqrt.f32 %v1441_v43  ;;  %v1421_v50 = vadd.f32 %v1420_v44, %v1380_v37  ;;  %v1415_v51 = vadd.f32 %v1414_v26, %v1377_v38  ;;  %v1383_v52 = vpop.xlane.xlu0 %1382  ;;  %v276_v43 = vld [vmem:[%s2626_s4 + $0x3] sm:$0x1] }
 0x338   : > { %1991 = vrsqrt.f32 %v1440_v45  ;;  %v1434_v54 = vmul.f32 0.015625, %v1401_v25  ;;  %v1412_v55 = vrot.slane %v1411_v48, 1  ;;  %v1406_v27 = vrot.slane %v1405_v49, 1 }
 0x339   : > { %v1422_v57 = vrot.slane %v1421_v50, 2  ;;  %v1416_v58 = vrot.slane %v1415_v51, 2  ;;  %v1426_v59 = vrot.slane %v1383_v52, 4 }
 0x33a   : > { %v1442_v20 = vadd.f32 1e-05, %v1434_v54  ;;  %v1413_v60 = vadd.f32 %v1412_v55, %v1411_v48  ;;  %v1407_v19 = vadd.f32 %v1406_v27, %v1405_v49  ;;  %v279_v49 = vld [vmem:[%s2626_s4 + $0x6] sm:$0x1]  ;;  %v280_v27 = vld [vmem:[%s2626_s4 + $0x7] sm:$0x1] }
 0x33b   : > { %v1423_v61 = vadd.f32 %v1422_v57, %v1421_v50  ;;  %v1417_v62 = vadd.f32 %v1416_v58, %v1415_v51  ;;  %v1427_v63 = vadd.f32 %v1426_v59, %v1383_v52  ;;  %v278_v51 = vld [vmem:[%s2626_s4 + $0x5] sm:$0x1] }
 0x33c   : > { %1993 = vrsqrt.f32 %v1442_v20  ;;  %v1436_v2 = vmul.f32 0.015625, %v1413_v60  ;;  %v1435_v0 = vmul.f32 0.015625, %v1407_v19  ;;  %v1820_v60 = vld [vmem:[%s2627_s5 + $0x6] ss:$0 sm:$0xff] }
 0x33d   : > { %v1424_v4 = vrot.slane %v1423_v61, 1  ;;  %v1418_v5 = vrot.slane %v1417_v62, 1  ;;  %v1428_v6 = vrot.slane %v1427_v63, 2 }
 0x33e   : > { %v1444_v7 = vadd.f32 1e-05, %v1436_v2  ;;  %v1443_v8 = vadd.f32 1e-05, %v1435_v0 }
 0x33f   : > { %v1425_v9 = vadd.f32 %v1424_v4, %v1423_v61  ;;  %v1419_v10 = vadd.f32 %v1418_v5, %v1417_v62  ;;  %v1429_v1 = vadd.f32 %v1428_v6, %v1427_v63  ;;  %v1821_v61 = vld [vmem:[%s2627_s5 + $0x7] ss:$0 sm:$0xff]  ;;  %v1586_v62 = vpop.permute.xlu0 %1585  ;;  %v1590_v63 = vpop.permute.xlu1 %1589 }
 0x340   : > { %1995 = vrsqrt.f32 %v1444_v7 }
 0x341   : > { %v1990_v14 = vpop.eup %1989  ;;  %1997 = vrsqrt.f32 %v1443_v8  ;;  %v1438_v16 = vmul.f32 0.015625, %v1425_v9  ;;  %v1437_v18 = vmul.f32 0.015625, %v1419_v10  ;;  %v1430_v21 = vrot.slane %v1429_v1, 1 }
 0x342   : > { %v1992_v23 = vpop.eup %1991  ;;  %v1457_v29 = vmul.f32 %v1990_v14, %v274_v15 }
 0x343   : > { %v1446_v30 = vadd.f32 1e-05, %v1438_v16  ;;  %v1445_v31 = vadd.f32 1e-05, %v1437_v18  ;;  %v1431_v22 = vadd.f32 %v1430_v21, %v1429_v1  ;;  %v1456_v32 = vmul.f32 %v1992_v23, %v273_v13  ;;  %v1594_v2 = vpop.permute.xlu0 %1593  ;;  %v1598_v0 = vpop.permute.xlu1 %1597 }
 0x344   : > { %v1479_v24 = vrot.slane %v1457_v29, %v1474_v17 }
 0x345   : > { %1999 = vrsqrt.f32 %v1446_v30  ;;  %v1439_v36 = vmul.f32 0.015625, %v1431_v22  ;;  %v1475_v37 = vrot.slane %v1456_v32, %v1474_v17 }
 0x346   : > { %v1994_v38 = vpop.eup %1993  ;;  %2001 = vrsqrt.f32 %v1445_v31  ;;  %1509 = vperm.xlu0 %1987, %v1479_v24  }
 0x347   : > { %v1447_v39 = vadd.f32 1e-05, %v1439_v36  ;;  %1505 = vperm.xlu1 %1988, %v1475_v37   ;;  %v1458_v40 = vmul.f32 %v1994_v38, %v275_v35  ;;  %v1602_v3 = vpop.permute.xlu0 %1601  ;;  %v1606_v4 = vpop.permute.xlu1 %1605 }
 0x349   : > { %2003 = vrsqrt.f32 %v1447_v39  ;;  %v1483_v42 = vrot.slane %v1458_v40, %v1474_v17 }
 0x34a   : > { %v1996_v44 = vpop.eup %1995 }
 0x34b   : > { %v1998_v26 = vpop.eup %1997  ;;  %1513 = vperm.xlu1 %1988, %v1483_v42   ;;  %v1460_v45 = vmul.f32 %v1996_v44, %v277_v41 }
 0x34c   : > { %v1459_v25 = vmul.f32 %v1998_v26, %v276_v43 }
 0x34d   : > { %v1491_v48 = vrot.slane %v1460_v45, %v1474_v17 }
 0x34e   : > { %v1487_v50 = vrot.slane %v1459_v25, %v1474_v17 }
 0x34f   : > { %v2000_v52 = vpop.eup %1999  ;;  %1521 = vperm.xlu0 %1987, %v1491_v48  }
 0x350   : > { %v2002_v53 = vpop.eup %2001  ;;  %1517 = vperm.xlu1 %1988, %v1487_v50   ;;  %v1462_v54 = vmul.f32 %v2000_v52, %v279_v49 }
 0x351   : > { %v1461_v55 = vmul.f32 %v2002_v53, %v278_v51 }
 0x352   : > { %v1499_v57 = vrot.slane %v1462_v54, %v1474_v17 }
 0x353   : > { %v2004_v58 = vpop.eup %2003  ;;  %v1495_v59 = vrot.slane %v1461_v55, %v1474_v17 }
 0x354   : > { %1529 = vperm.xlu0 %1987, %v1499_v57   ;;  %v1463_v20 = vmul.f32 %v2004_v58, %v280_v27 }
 0x355   : > { %1525 = vperm.xlu1 %1988, %v1495_v59  }
 0x356   : > { %v1503_v19 = vrot.slane %v1463_v20, %v1474_v17 }
 0x358   : > { %1609 = vperm.xlu0 %1987, %v1820_v60  }
 0x359   : > { %1533 = vperm.xlu1 %1988, %v1503_v19  }
 0x35d   : > { %1613 = vperm.xlu1 %1988, %v1821_v61  }
 0x3c5   : > { %v1510_v5 = vpop.permute.xlu0 %1509 }
 0x3c6   : > { %v1506_v6 = vpop.permute.xlu1 %1505  ;;  %v1537_v7 = vmul.f32 %v1510_v5, %v2448_v12 }
 0x3c7   : > { %v1536_v8 = vmul.f32 %v1506_v6, %v2451_v11 }
 0x3c8   : > { %v1617_v9 = vadd.f32 %v1590_v63, %v1537_v7 }
 0x3c9   : > { %v1616_v10 = vadd.f32 %v1586_v62, %v1536_v8 }
 0x3ca   : > { %v1625_v1 = vmul.f32 0.01, %v1617_v9  ;;  %v1514_v15 = vpop.permute.xlu1 %1513 }
 0x3cb   : > { %v1624_v13 = vmul.f32 0.01, %v1616_v10  ;;  %v1538_v17 = vmul.f32 %v1514_v15, %v2459_v33 }
 0x3cc   : > { %v1633_v14 = vmax.f32 %v1617_v9, %v1625_v1 }
 0x3cd   : > { %v1632_v16 = vmax.f32 %v1616_v10, %v1624_v13  ;;  %v1618_v18 = vadd.f32 %v1594_v2, %v1538_v17 }
 0x3ce   : > { %1641 = vst.msk [vmem:[%s2548_s12 + $0x8] sm:$0xff] %vm1263_vm2, %v1633_v14  ;;  %v1522_v12 = vpop.permute.xlu0 %1521 }
 0x3cf   : > { %1640 = vst.msk [vmem:[%s2548_s12] sm:$0xff] %vm1263_vm2, %v1632_v16  ;;  %v1626_v11 = vmul.f32 0.01, %v1618_v18  ;;  %v1518_v21 = vpop.permute.xlu1 %1517  ;;  %v1540_v23 = vmul.f32 %v1522_v12, %v2462_v34 }
 0x3d0   : > { %v1539_v33 = vmul.f32 %v1518_v21, %v2471_v46 }
 0x3d1   : > { %v1634_v29 = vmax.f32 %v1618_v18, %v1626_v11  ;;  %v1620_v30 = vadd.f32 %v1602_v3, %v1540_v23 }
 0x3d2   : > { %v1619_v31 = vadd.f32 %v1598_v0, %v1539_v33 }
 0x3d3   : > { %1642 = vst.msk [vmem:[%s2548_s12 + $0x10] sm:$0xff] %vm1263_vm2, %v1634_v29  ;;  %v1628_v22 = vmul.f32 0.01, %v1620_v30  ;;  %v1530_v32 = vpop.permute.xlu0 %1529 }
 0x3d4   : > { %v1627_v24 = vmul.f32 0.01, %v1619_v31  ;;  %v1526_v35 = vpop.permute.xlu1 %1525  ;;  %v1542_v34 = vmul.f32 %v1530_v32, %v2474_v47 }
 0x3d5   : > { %v1636_v36 = vmax.f32 %v1620_v30, %v1628_v22  ;;  %v1541_v37 = vmul.f32 %v1526_v35, %v2483_v28 }
 0x3d6   : > { %v1635_v38 = vmax.f32 %v1619_v31, %v1627_v24 }
 0x3d7   : > { %1644 = vst.msk [vmem:[%s2548_s12 + $0x20] sm:$0xff] %vm1263_vm2, %v1636_v36  ;;  %v1621_v46 = vadd.f32 %v1606_v4, %v1541_v37  ;;  %v1610_v39 = vpop.permute.xlu0 %1609 }
 0x3d8   : > { %1643 = vst.msk [vmem:[%s2548_s12 + $0x18] sm:$0xff] %vm1263_vm2, %v1635_v38  ;;  %v1534_v40 = vpop.permute.xlu1 %1533  ;;  %v1622_v41 = vadd.f32 %v1610_v39, %v1542_v34 }
 0x3d9   : > { %v1629_v42 = vmul.f32 0.01, %v1621_v46  ;;  %v1543_v28 = vmul.f32 %v1534_v40, %v2488_v56 }
 0x3da   : > { %v1630_v43 = vmul.f32 0.01, %v1622_v41 }
 0x3db   : > { %v1637_v44 = vmax.f32 %v1621_v46, %v1629_v42 }
 0x3dc   : > { %v1638_v26 = vmax.f32 %v1622_v41, %v1630_v43  ;;  %v1614_v47 = vpop.permute.xlu1 %1613 }
 0x3dd   : > { %1645 = vst.msk [vmem:[%s2548_s12 + $0x28] sm:$0xff] %vm1263_vm2, %v1637_v44  ;;  %v1623_v45 = vadd.f32 %v1614_v47, %v1543_v28 }
 0x3de   : > { %1646 = vst.msk [vmem:[%s2548_s12 + $0x30] sm:$0xff] %vm1263_vm2, %v1638_v26 }
 0x3df   : > { %v1631_v25 = vmul.f32 0.01, %v1623_v45 }
 0x3e1   : > { %v1639_v56 = vmax.f32 %v1623_v45, %v1631_v25 }
 0x3e3   : > { %1647 = vst.msk [vmem:[%s2548_s12 + $0x38] sm:$0xff] %vm1263_vm2, %v1639_v56 }
 0x3e4   : > { %2048 = shalt.err (!%p2045_p2)
}
 0x3e5   : > { %s2049_s15 = scalar_lea.hbm %s2574_s19, 1024  ;;  %s2053_s28 = scalar_lea.hbm %s2628_s6, 2048 }
 0x3e6   : > { %p2050_p4 = scmp.ne.s32.totalorder %s2574_s19, %s2049_s15  ;;  %p2054_p9 = scmp.lt.u32.totalorder %s2574_s19, %s2628_s6 }
 0x3e7   : > { %p2055_p1 = scmp.lt.u32.totalorder %s2053_s28, %s2049_s15  ;;  %p2057_p6 = scmp.lt.u32.totalorder %s2049_s15, %s2574_s19 }
 0x3e8   : > { %p2051_p5 = pnand %p2050_p4, %p2635_p11 }
 0x3e9   : > { %p2056_p3 = por %p2055_p1, %p2054_p9 }
 0x3ea   : > { %p2052_p7 = pneg %p2051_p5 }
 0x3eb   : > { %p2058_p12 = por %p2057_p6, %p2056_p3 }
 0x3ed   : > { %p2059_p13 = pnand %p2058_p12, %p2052_p7 }
 0x3ef   : > { %2062 = shalt.err (!%p2059_p13)
}
 0x3f0   : > { %s2111_s16 = smov 128   ;;  %s2112_s18 = smov 8  }
 0x3f1   : > { %1935 = dma.vmem_to_hbm [thread:$0]  (%p2635_p11), %s2576_s8, 1024, %s2574_s19, %s1649_s13, %s2111_s16, %s2111_s16, %s2112_s18  }
 0x3f2 PF: > { %s1677_s20 = sand.u32 1, %s2089_s21   ;;  %p2636_p8 = scmp.ne.s32.totalorder %s2633_s10, 0 }
 0x3f3   : > { %p2637_p10 = scmp.ge.s32.totalorder %s2101_s24, 2  ;;  %s1678_s25 = scalar_lea.sflag [#allocation4], %s1677_s20 }
 0x3f5   : > { %p1942_p0 = pnand %p2637_p10, %p2636_p8 }
 0x3f7   : > { %2084 = dma.done.wait (!%p1942_p0), %s1678_s25, 1024  }
 0x3f8   : > { %2086 = vsyncadd (!%p1942_p0), %s1678_s25, 4294966272  ;;  %p19_p2 = scmp.ge.s32.totalorder %s2173_s27, 4   ;;  %s2638_s21 = smov %s2093_s22 }
 0x3f9   : > { %s2639_s22 = smov %s2097_s23  ;;  %s2640_s23 = smov %s2185_s30 }
 0x3fa   : > { %s2641_s24 = smov %s2173_s27  ;;  %21 = sbr.rel (!%p19_p2) target bundleno = 5 (0x5), region = 95 }
 0x401   :  { %1683 = vsyncpa [#allocation3], 1 }
 0x402   :  { %1685 = vsyncpa [#allocation3 + $0x1], 1 }
 0x403   :  { %1686 = vsyncpa [#allocation4], 1 }
 0x404   :  { %1688 = vsyncpa [#allocation4 + $0x1], 1 }

</bundles_post_ra>
